<compile_context>
chip_gen: v7x
topology: tpu7x:2x2x1
jax: 0.10.0
libtpu: 0.0.40
codegen_flags: <defaults>
</compile_context>

<pallas_src>
import jax
import jax.numpy as jnp
from jax import lax
from jax.experimental import pallas as pl
from jax.experimental.pallas import tpu as pltpu


def resblock_kernel(x_ref, w1_ref, b1_ref, w2_ref, b2_ref, o_ref, xpad_scr):
    _, H, WC = x_ref.shape
    x = x_ref[0]                                     # (H, W*C) lane-dense

    # Zero only the 1-row halo of the padded scratch; the interior rows are
    # fully overwritten below (no full-buffer zero fill).
    zrow = jnp.zeros((1, WC), jnp.float32)
    xpad_scr[0:1, :] = zrow
    xpad_scr[H + 1:H + 2, :] = zrow

    def conv3x3(w_ref, b_ref):
        # 3 banded matmuls (one per vertical tap dy); horizontal taps and the
        # horizontal zero padding are folded into the (W*C, W*C) band matrix.
        acc = jnp.zeros((H, WC), jnp.float32)
        for dy in range(3):
            acc = acc + jnp.dot(xpad_scr[dy:dy + H, :], w_ref[dy],
                                preferred_element_type=jnp.float32)
        return acc + b_ref[...]                      # (1, W*C) bias broadcast

    # conv1 + folded-BN1 + ReLU
    xpad_scr[1:H + 1, :] = x
    y1 = jnp.maximum(conv3x3(w1_ref, b1_ref), 0.0)

    # conv2 + folded-BN2 (reuse the same scratch; halo rows still zero)
    xpad_scr[1:H + 1, :] = y1
    z = conv3x3(w2_ref, b2_ref)

    # residual add + ReLU; full 128-lane-wide stores
    o_ref[0] = jnp.maximum(z + x, 0.0)


def resblock_forward(x_nchw, params, eps=1e-5):
    """Pallas ResBlock forward. x_nchw: (N, C, H, W) float32 -> (N, C, H, W)."""
    (w1, b1, g1, be1, m1, v1, w2, b2, g2, be2, m2, v2) = params
    N, C, H, W = x_nchw.shape
    WC = W * C

    # NCHW -> NHWC -> lane-packed (N, H, W*C).
    # TODO(synk): keeping the surrounding model in NHWC / lane-packed layout
    # end-to-end would remove these two HBM transposes entirely.
    x = jnp.transpose(x_nchw, (0, 2, 3, 1)).astype(jnp.float32).reshape(N, H, WC)

    def fold(w, b, g, be, m, v):
        # Eval-mode BN folded into the conv: scale into the weights, bias kept.
        scale = (g / jnp.sqrt(v + eps)).astype(jnp.float32)          # (C,)
        bias = ((b - m) * scale + be).astype(jnp.float32)            # (C,)
        wf = w.astype(jnp.float32) * scale[:, None, None, None]      # (Co,Ci,3,3)
        wt = jnp.transpose(wf, (2, 3, 1, 0))                         # (dy,dx,Ci,Co)
        # Block-banded (W*C, W*C) matrix per vertical tap dy:
        #   band[dy][w_in*C+ci, w_out*C+co] = wf[co, ci, dy, dx]
        #   with w_in = w_out + dx - 1  (i.e. eye offset k = 1 - dx);
        # the truncated band edges implement the horizontal zero padding.
        band = jnp.stack([
            sum(jnp.kron(jnp.eye(W, k=1 - dx, dtype=jnp.float32), wt[dy, dx])
                for dx in range(3))
            for dy in range(3)
        ])                                                           # (3, WC, WC)
        bias_row = jnp.tile(bias, W).reshape(1, WC)                  # lane w*C+co
        return band, bias_row

    wb1, bias1 = fold(w1, b1, g1, be1, m1, v1)
    wb2, bias2 = fold(w2, b2, g2, be2, m2, v2)

    out = pl.pallas_call(
        resblock_kernel,
        out_shape=jax.ShapeDtypeStruct((N, H, WC), jnp.float32),
        grid_spec=pltpu.PrefetchScalarGridSpec(
            num_scalar_prefetch=0,
            grid=(N,),
            in_specs=[
                pl.BlockSpec((1, H, WC), lambda n: (n, 0, 0)),    # x (per image)
                pl.BlockSpec((3, WC, WC), lambda n: (0, 0, 0)),   # conv1 bands
                pl.BlockSpec((1, WC), lambda n: (0, 0)),          # bias1 row
                pl.BlockSpec((3, WC, WC), lambda n: (0, 0, 0)),   # conv2 bands
                pl.BlockSpec((1, WC), lambda n: (0, 0)),          # bias2 row
            ],
            out_specs=pl.BlockSpec((1, H, WC), lambda n: (n, 0, 0)),
            scratch_shapes=[pltpu.VMEM((H + 2, WC), jnp.float32)],
        ),
        compiler_params=pltpu.CompilerParams(
            dimension_semantics=("parallel",)),
    )(x, wb1, bias1, wb2, bias2)

    # lane-packed (N, H, W*C) -> NHWC -> NCHW
    return jnp.transpose(out.reshape(N, H, W, C), (0, 3, 1, 2))


def resblock_ref(x, params, eps=1e-5):
    """Pure-JAX reference matching the PyTorch ResBlock (eval-mode BN)."""
    (w1, b1, g1, be1, m1, v1, w2, b2, g2, be2, m2, v2) = params

    def conv(x, w, b):
        y = lax.conv_general_dilated(x, w, (1, 1), ((1, 1), (1, 1)),
                                     dimension_numbers=('NCHW', 'OIHW', 'NCHW'))
        return y + b[None, :, None, None]

    def bn(x, g, be, m, v):
        return ((x - m[None, :, None, None])
                / jnp.sqrt(v + eps)[None, :, None, None]
                * g[None, :, None, None] + be[None, :, None, None])

    y = jax.nn.relu(bn(conv(x, w1, b1), g1, be1, m1, v1))
    y = bn(conv(y, w2, b2), g2, be2, m2, v2)
    return jax.nn.relu(y + x)


if __name__ == "__main__":
    N, C, H, W = 2, 8, 16, 16   # num_hidden = 8 -> W*C = 128 (lane-dense)
    key = jax.random.PRNGKey(0)
    kx, k1, k2 = jax.random.split(key, 3)

    x = jax.random.normal(kx, (N, C, H, W), jnp.float32)

    def make_conv_bn(k):
        kw, kb, kg, kbe, km, kv = jax.random.split(k, 6)
        w = jax.random.normal(kw, (C, C, 3, 3), jnp.float32) * 0.1
        b = jax.random.normal(kb, (C,), jnp.float32) * 0.1
        g = 1.0 + 0.1 * jax.random.normal(kg, (C,), jnp.float32)
        be = 0.1 * jax.random.normal(kbe, (C,), jnp.float32)
        m = 0.1 * jax.random.normal(km, (C,), jnp.float32)
        v = 1.0 + 0.1 * jnp.abs(jax.random.normal(kv, (C,), jnp.float32))
        return (w, b, g, be, m, v)

    params = make_conv_bn(k1) + make_conv_bn(k2)

    out = resblock_forward(x, params)
    out = jax.block_until_ready(out)

    ref = resblock_ref(x, params)
    assert out.shape == (N, C, H, W)
    err = float(jnp.max(jnp.abs(out - ref)))
    assert jnp.allclose(out, ref, atol=1e-3, rtol=1e-3), f"max abs err {err}"

    print("KERNEL_OK")
</pallas_src>

<mosaic_0001>
module attributes {stable_mosaic.version = 11 : i64} {
  func.func @resblock_kernel(%arg0: i32, %arg1: memref<1x16x128xf32, #tpu.memory_space<vmem>>, %arg2: memref<3x128x128xf32, #tpu.memory_space<vmem>>, %arg3: memref<1x128xf32, #tpu.memory_space<vmem>>, %arg4: memref<3x128x128xf32, #tpu.memory_space<vmem>>, %arg5: memref<1x128xf32, #tpu.memory_space<vmem>>, %arg6: memref<1x16x128xf32, #tpu.memory_space<vmem>>, %arg7: memref<18x128xf32, #tpu.memory_space<vmem>>) attributes {dimension_semantics = [#tpu.dimension_semantics<parallel>], iteration_bounds = array<i64: 2>, scalar_prefetch = 0 : i64, scratch_operands = 1 : i64, tpu.core_type = #tpu.core_type<tc>, window_params = [{transform_indices = @transform_0, window_bounds = array<i64: 1, 16, 128>}, {pipeline_mode = #tpu.pipeline_mode<synchronous>, transform_indices = @transform_1, window_bounds = array<i64: 3, 128, 128>}, {pipeline_mode = #tpu.pipeline_mode<synchronous>, transform_indices = @transform_2, window_bounds = array<i64: 1, 128>}, {pipeline_mode = #tpu.pipeline_mode<synchronous>, transform_indices = @transform_3, window_bounds = array<i64: 3, 128, 128>}, {pipeline_mode = #tpu.pipeline_mode<synchronous>, transform_indices = @transform_4, window_bounds = array<i64: 1, 128>}, {transform_indices = @transform_5, window_bounds = array<i64: 1, 16, 128>}]} {
    %c0 = arith.constant 0 : index
    %c0_0 = arith.constant 0 : index
    %c0_1 = arith.constant 0 : index
    %0 = vector.load %arg1[%c0, %c0_0, %c0_1] : memref<1x16x128xf32, #tpu.memory_space<vmem>>, vector<1x16x128xf32>
    %1 = vector.shape_cast %0 : vector<1x16x128xf32> to vector<16x128xf32>
    %cst = arith.constant 0.000000e+00 : f32
    %2 = vector.broadcast %cst : f32 to vector<1x128xf32>
    %c0_2 = arith.constant 0 : index
    %c0_3 = arith.constant 0 : index
    %3 = vector.load %arg7[%c0_2, %c0_3] : memref<18x128xf32, #tpu.memory_space<vmem>>, vector<1x128xf32>
    tpu.vector_store %arg7[%c0_2, %c0_3], %2 {strides = array<i32>} : memref<18x128xf32, #tpu.memory_space<vmem>>, vector<1x128xf32>,
    %c17 = arith.constant 17 : index
    %c0_4 = arith.constant 0 : index
    %4 = vector.load %arg7[%c17, %c0_4] : memref<18x128xf32, #tpu.memory_space<vmem>>, vector<1x128xf32>
    tpu.vector_store %arg7[%c17, %c0_4], %2 {strides = array<i32>} : memref<18x128xf32, #tpu.memory_space<vmem>>, vector<1x128xf32>,
    %c1 = arith.constant 1 : index
    %c0_5 = arith.constant 0 : index
    %5 = vector.load %arg7[%c1, %c0_5] : memref<18x128xf32, #tpu.memory_space<vmem>>, vector<16x128xf32>
    tpu.vector_store %arg7[%c1, %c0_5], %1 {strides = array<i32>} : memref<18x128xf32, #tpu.memory_space<vmem>>, vector<16x128xf32>,
    %cst_6 = arith.constant 0.000000e+00 : f32
    %6 = vector.broadcast %cst_6 : f32 to vector<16x128xf32>
    %c0_7 = arith.constant 0 : index
    %c0_8 = arith.constant 0 : index
    %7 = vector.load %arg7[%c0_7, %c0_8] : memref<18x128xf32, #tpu.memory_space<vmem>>, vector<16x128xf32>
    %c0_9 = arith.constant 0 : index
    %c0_10 = arith.constant 0 : index
    %c0_11 = arith.constant 0 : index
    %8 = vector.load %arg2[%c0_9, %c0_10, %c0_11] : memref<3x128x128xf32, #tpu.memory_space<vmem>>, vector<1x128x128xf32>
    %9 = vector.shape_cast %8 : vector<1x128x128xf32> to vector<128x128xf32>
    %cst_12 = arith.constant dense<0.000000e+00> : vector<16x128xf32>
    %10 = tpu.matmul %7, %9, %cst_12 {dimension_numbers = #tpu.dot_dimension_numbers<[1], [0], [0], [1], [0, 0, 1, 1], [], []>} : vector<16x128xf32>, vector<128x128xf32>, vector<16x128xf32> -> vector<16x128xf32>
    %11 = arith.addf %6, %10 : vector<16x128xf32>
    %c1_13 = arith.constant 1 : index
    %c0_14 = arith.constant 0 : index
    %12 = vector.load %arg7[%c1_13, %c0_14] : memref<18x128xf32, #tpu.memory_space<vmem>>, vector<16x128xf32>
    %c1_15 = arith.constant 1 : index
    %c0_16 = arith.constant 0 : index
    %c0_17 = arith.constant 0 : index
    %13 = vector.load %arg2[%c1_15, %c0_16, %c0_17] : memref<3x128x128xf32, #tpu.memory_space<vmem>>, vector<1x128x128xf32>
    %14 = vector.shape_cast %13 : vector<1x128x128xf32> to vector<128x128xf32>
    %cst_18 = arith.constant dense<0.000000e+00> : vector<16x128xf32>
    %15 = tpu.matmul %12, %14, %cst_18 {dimension_numbers = #tpu.dot_dimension_numbers<[1], [0], [0], [1], [0, 0, 1, 1], [], []>} : vector<16x128xf32>, vector<128x128xf32>, vector<16x128xf32> -> vector<16x128xf32>
    %16 = arith.addf %11, %15 : vector<16x128xf32>
    %c2 = arith.constant 2 : index
    %c0_19 = arith.constant 0 : index
    %17 = vector.load %arg7[%c2, %c0_19] : memref<18x128xf32, #tpu.memory_space<vmem>>, vector<16x128xf32>
    %c2_20 = arith.constant 2 : index
    %c0_21 = arith.constant 0 : index
    %c0_22 = arith.constant 0 : index
    %18 = vector.load %arg2[%c2_20, %c0_21, %c0_22] : memref<3x128x128xf32, #tpu.memory_space<vmem>>, vector<1x128x128xf32>
    %19 = vector.shape_cast %18 : vector<1x128x128xf32> to vector<128x128xf32>
    %cst_23 = arith.constant dense<0.000000e+00> : vector<16x128xf32>
    %20 = tpu.matmul %17, %19, %cst_23 {dimension_numbers = #tpu.dot_dimension_numbers<[1], [0], [0], [1], [0, 0, 1, 1], [], []>} : vector<16x128xf32>, vector<128x128xf32>, vector<16x128xf32> -> vector<16x128xf32>
    %21 = arith.addf %16, %20 : vector<16x128xf32>
    %c0_24 = arith.constant 0 : index
    %c0_25 = arith.constant 0 : index
    %22 = vector.load %arg3[%c0_24, %c0_25] : memref<1x128xf32, #tpu.memory_space<vmem>>, vector<1x128xf32>
    %23 = vector.broadcast %22 : vector<1x128xf32> to vector<16x128xf32>
    %24 = arith.addf %21, %23 : vector<16x128xf32>
    %cst_26 = arith.constant 0.000000e+00 : f32
    %25 = vector.broadcast %cst_26 : f32 to vector<16x128xf32>
    %26 = arith.maximumf %24, %25 : vector<16x128xf32>
    %c1_27 = arith.constant 1 : index
    %c0_28 = arith.constant 0 : index
    %27 = vector.load %arg7[%c1_27, %c0_28] : memref<18x128xf32, #tpu.memory_space<vmem>>, vector<16x128xf32>
    tpu.vector_store %arg7[%c1_27, %c0_28], %26 {strides = array<i32>} : memref<18x128xf32, #tpu.memory_space<vmem>>, vector<16x128xf32>,
    %cst_29 = arith.constant 0.000000e+00 : f32
    %28 = vector.broadcast %cst_29 : f32 to vector<16x128xf32>
    %c0_30 = arith.constant 0 : index
    %c0_31 = arith.constant 0 : index
    %29 = vector.load %arg7[%c0_30, %c0_31] : memref<18x128xf32, #tpu.memory_space<vmem>>, vector<16x128xf32>
    %c0_32 = arith.constant 0 : index
    %c0_33 = arith.constant 0 : index
    %c0_34 = arith.constant 0 : index
    %30 = vector.load %arg4[%c0_32, %c0_33, %c0_34] : memref<3x128x128xf32, #tpu.memory_space<vmem>>, vector<1x128x128xf32>
    %31 = vector.shape_cast %30 : vector<1x128x128xf32> to vector<128x128xf32>
    %cst_35 = arith.constant dense<0.000000e+00> : vector<16x128xf32>
    %32 = tpu.matmul %29, %31, %cst_35 {dimension_numbers = #tpu.dot_dimension_numbers<[1], [0], [0], [1], [0, 0, 1, 1], [], []>} : vector<16x128xf32>, vector<128x128xf32>, vector<16x128xf32> -> vector<16x128xf32>
    %33 = arith.addf %28, %32 : vector<16x128xf32>
    %c1_36 = arith.constant 1 : index
    %c0_37 = arith.constant 0 : index
    %34 = vector.load %arg7[%c1_36, %c0_37] : memref<18x128xf32, #tpu.memory_space<vmem>>, vector<16x128xf32>
    %c1_38 = arith.constant 1 : index
    %c0_39 = arith.constant 0 : index
    %c0_40 = arith.constant 0 : index
    %35 = vector.load %arg4[%c1_38, %c0_39, %c0_40] : memref<3x128x128xf32, #tpu.memory_space<vmem>>, vector<1x128x128xf32>
    %36 = vector.shape_cast %35 : vector<1x128x128xf32> to vector<128x128xf32>
    %cst_41 = arith.constant dense<0.000000e+00> : vector<16x128xf32>
    %37 = tpu.matmul %34, %36, %cst_41 {dimension_numbers = #tpu.dot_dimension_numbers<[1], [0], [0], [1], [0, 0, 1, 1], [], []>} : vector<16x128xf32>, vector<128x128xf32>, vector<16x128xf32> -> vector<16x128xf32>
    %38 = arith.addf %33, %37 : vector<16x128xf32>
    %c2_42 = arith.constant 2 : index
    %c0_43 = arith.constant 0 : index
    %39 = vector.load %arg7[%c2_42, %c0_43] : memref<18x128xf32, #tpu.memory_space<vmem>>, vector<16x128xf32>
    %c2_44 = arith.constant 2 : index
    %c0_45 = arith.constant 0 : index
    %c0_46 = arith.constant 0 : index
    %40 = vector.load %arg4[%c2_44, %c0_45, %c0_46] : memref<3x128x128xf32, #tpu.memory_space<vmem>>, vector<1x128x128xf32>
    %41 = vector.shape_cast %40 : vector<1x128x128xf32> to vector<128x128xf32>
    %cst_47 = arith.constant dense<0.000000e+00> : vector<16x128xf32>
    %42 = tpu.matmul %39, %41, %cst_47 {dimension_numbers = #tpu.dot_dimension_numbers<[1], [0], [0], [1], [0, 0, 1, 1], [], []>} : vector<16x128xf32>, vector<128x128xf32>, vector<16x128xf32> -> vector<16x128xf32>
    %43 = arith.addf %38, %42 : vector<16x128xf32>
    %c0_48 = arith.constant 0 : index
    %c0_49 = arith.constant 0 : index
    %44 = vector.load %arg5[%c0_48, %c0_49] : memref<1x128xf32, #tpu.memory_space<vmem>>, vector<1x128xf32>
    %45 = vector.broadcast %44 : vector<1x128xf32> to vector<16x128xf32>
    %46 = arith.addf %43, %45 : vector<16x128xf32>
    %47 = arith.addf %46, %1 : vector<16x128xf32>
    %cst_50 = arith.constant 0.000000e+00 : f32
    %48 = vector.broadcast %cst_50 : f32 to vector<16x128xf32>
    %49 = arith.maximumf %47, %48 : vector<16x128xf32>
    %c0_51 = arith.constant 0 : index
    %c0_52 = arith.constant 0 : index
    %c0_53 = arith.constant 0 : index
    %50 = vector.load %arg6[%c0_51, %c0_52, %c0_53] : memref<1x16x128xf32, #tpu.memory_space<vmem>>, vector<1x16x128xf32>
    %51 = vector.shape_cast %50 : vector<1x16x128xf32> to vector<16x128xf32>
    %52 = vector.shape_cast %49 : vector<16x128xf32> to vector<1x16x128xf32>
    tpu.vector_store %arg6[%c0_51, %c0_52, %c0_53], %52 {strides = array<i32>} : memref<1x16x128xf32, #tpu.memory_space<vmem>>, vector<1x16x128xf32>,
    return
  }
  func.func @transform_0(%arg0: i32) -> (i32, i32, i32) {
    %c0_i32 = arith.constant 0 : i32
    %c0_i32_0 = arith.constant 0 : i32
    %c0_i32_1 = arith.constant 0 : i32
    return %arg0, %c0_i32, %c0_i32_0 : i32, i32, i32
  }
  func.func @transform_1(%arg0: i32) -> (i32, i32, i32) {
    %c0_i32 = arith.constant 0 : i32
    %c0_i32_0 = arith.constant 0 : i32
    %c0_i32_1 = arith.constant 0 : i32
    %c0_i32_2 = arith.constant 0 : i32
    return %c0_i32, %c0_i32_0, %c0_i32_1 : i32, i32, i32
  }
  func.func @transform_2(%arg0: i32) -> (i32, i32) {
    %c0_i32 = arith.constant 0 : i32
    %c0_i32_0 = arith.constant 0 : i32
    %c0_i32_1 = arith.constant 0 : i32
    return %c0_i32, %c0_i32_0 : i32, i32
  }
  func.func @transform_3(%arg0: i32) -> (i32, i32, i32) {
    %c0_i32 = arith.constant 0 : i32
    %c0_i32_0 = arith.constant 0 : i32
    %c0_i32_1 = arith.constant 0 : i32
    %c0_i32_2 = arith.constant 0 : i32
    return %c0_i32, %c0_i32_0, %c0_i32_1 : i32, i32, i32
  }
  func.func @transform_4(%arg0: i32) -> (i32, i32) {
    %c0_i32 = arith.constant 0 : i32
    %c0_i32_0 = arith.constant 0 : i32
    %c0_i32_1 = arith.constant 0 : i32
    return %c0_i32, %c0_i32_0 : i32, i32
  }
  func.func @transform_5(%arg0: i32) -> (i32, i32, i32) {
    %c0_i32 = arith.constant 0 : i32
    %c0_i32_0 = arith.constant 0 : i32
    %c0_i32_1 = arith.constant 0 : i32
    return %arg0, %c0_i32, %c0_i32_0 : i32, i32, i32
  }
}

</mosaic_0001>

<bundles_post_ra>
// kernel: tpu_custom_call.1
= control target key start
LH: loop header
LB: loop body
LE: loop exit
PB: predicated region body
PF: predicated region fallthrough
CT: control target
= control target key end

     0   :  { %10 = vsyncpa [#allocation4], 0  ;;  %s2050_s0 = inlined_call_operand.hbm [shape: f32[2,16,128], index: 0, kind: input, shape index: {}]   ;;  %s2051_s1 = inlined_call_operand.hbm [shape: f32[3,128,128], index: 1, kind: input, shape index: {}]   ;;  %s2052_s2 = inlined_call_operand.vmem [shape: f32[1,128], index: 2, kind: input, shape index: {}]   ;;  %s2053_s3 = inlined_call_operand.hbm [shape: f32[3,128,128], index: 3, kind: input, shape index: {}]   ;;  %s2054_s4 = inlined_call_operand.vmem [shape: f32[1,128], index: 4, kind: input, shape index: {}]   ;;  %s2055_s5 = inlined_call_operand.hbm [shape: f32[2,16,128], index: 5, kind: output, shape index: {}]  }
   0x1   :  { %12 = vsyncpa [#allocation4 + $0x1], 0 }
   0x2   :  { %13 = vsyncpa [#allocation7], 0 }
   0x3   :  { %14 = vsyncpa [#allocation5], 0 }
   0x4   :  { %16 = vsyncpa [#allocation5 + $0x1], 0  ;;  %s1787_s18 = smov 0   ;;  %s1789_s19 = smov 0  }
   0x5   :  { %s1791_s20 = smov 0   ;;  %s1793_s21 = smov 0  }
   0x6 LB: > { %s1808_s22 = sadd.s32 4294967295, %s1746_s21   ;;  %s978_s23 = sadd.s32 4294967294, %s1746_s21   ;;  %s1746_s21 = sphi %s1793_s21, %s2075_s21   ;;  %s1742_s20 = sphi %s1791_s20, %s2074_s20   ;;  %s1738_s19 = sphi %s1789_s19, %s2073_s19   ;;  %s1734_s18 = sphi %s1787_s18, %s2072_s18  }
   0x7   : > { %p42_p0 = scmp.ne.s32.totalorder %s1738_s19, %s1734_s18  ;;  %p2056_p1 = scmp.eq.s32.totalorder %s1808_s22, 0 }
   0x8   : > { %p156_p3 = scmp.eq.s32.totalorder %s978_s23, 1  ;;  %p979_p5 = scmp.ge.s32.totalorder %s1746_s21, 1 }
   0x9   : > { %p1817_p4 = por %p2056_p1, %p42_p0  ;;  %p163_p7 = scmp.lt.s32.totalorder %s1746_s21, 3 }
   0xa   : > { %p1822_p6 = por %p156_p3, %p42_p0  ;;  %s1748_s27 = smov [#allocation6]  }
   0xb   : > { %s2059_s24 = scalar_select %p1817_p4, 1, 0 }
   0xc   : > { %s2060_s25 = scalar_select %p1822_p6, 1, 0 }
   0xd   : > { %p1827_p8 = pnand %p979_p5, %p163_p7  ;;  %s175_s28 = sshll.u32 %s1748_s27, 4  ;;  %s1831_s28 = int_to_ptr.vmem [resolvable:$true] %s175_s28 }
   0xe   : > { %s1749_s30 = smov [#allocation8]   ;;  %s1590_s9 = scalar_lea.hbm %s2051_s1, 6144 }
   0xf   : > { %p1530_p9 = pneg %p1827_p8  ;;  %s191_s6 = sshll.u32 %s1749_s30, 4  ;;  %s1842_s6 = int_to_ptr.vmem [resolvable:$true] %s191_s6 }
  0x10   : > { %p1591_p12 = scmp.ne.s32.totalorder %s2051_s1, %s1590_s9  ;;  %p1597_p5 = scmp.lt.u32.totalorder %s1590_s9, %s2051_s1 }
  0x11   : > { %p1838_p11 = pnand %p1530_p9, %p2056_p1 }
  0x13   : > { %p1592_p13 = pneg %p1838_p11 }
  0x15   : > { %p1593_p0 = pnand %p1592_p13, %p1591_p12 }
  0x17   : > { %p1594_p3 = pneg %p1593_p0 }
  0x19   : > { %p1599_p7 = pnand %p1597_p5, %p1594_p3 }
  0x1b   : > { %1602 = shalt.err (!%p1599_p7)
}
  0x1c   : > { %s1603_s14 = scalar_lea.vmem %s1831_s28, 6144  ;;  %p1611_p2 = scmp.lt.s32.totalorder %s1831_s28, %s1831_s28 }
  0x1d   : > { %p1604_p9 = scmp.ne.s32.totalorder %s1831_s28, %s1603_s14  ;;  %p1612_p12 = scmp.lt.s32.totalorder %s1603_s14, %s1603_s14 }
  0x1f   : > { %p1606_p10 = pnand %p1604_p9, %p1592_p13  ;;  %p1613_p0 = por %p1612_p12, %p1611_p2 }
  0x21   : > { %p1607_p1 = pneg %p1606_p10 }
  0x23   : > { %p1614_p6 = pnand %p1613_p0, %p1607_p1 }
  0x25   : > { %1617 = shalt.err (!%p1614_p6)
}
  0x26   : > { %s1750_s15 = smov 128   ;;  %s1751_s16 = smov 8  }
  0x27   : > { %1533 = dma.hbm_to_vmem [thread:$0]  (!%p1838_p11), %s2051_s1, 6144, %s1831_s28, [#allocation7], %s1750_s15, %s1750_s15, %s1751_s16  }
  0x28   : > { %s1618_s7 = scalar_lea.hbm %s2053_s3, 6144 }
  0x29   : > { %p1619_p1 = scmp.ne.s32.totalorder %s2053_s3, %s1618_s7  ;;  %p1625_p10 = scmp.lt.u32.totalorder %s1618_s7, %s2053_s3 }
  0x2b   : > { %p1621_p2 = pnand %p1619_p1, %p1592_p13 }
  0x2d   : > { %p1622_p6 = pneg %p1621_p2 }
  0x2f   : > { %p1627_p3 = pnand %p1625_p10, %p1622_p6 }
  0x31   : > { %1630 = shalt.err (!%p1627_p3)
}
  0x32   : > { %s1631_s28 = scalar_lea.vmem %s1842_s6, 6144  ;;  %p1639_p12 = scmp.lt.s32.totalorder %s1842_s6, %s1842_s6 }
  0x33   : > { %p1632_p5 = scmp.ne.s32.totalorder %s1842_s6, %s1631_s28  ;;  %p1640_p0 = scmp.lt.s32.totalorder %s1631_s28, %s1631_s28 }
  0x35   : > { %p1634_p7 = pnand %p1632_p5, %p1592_p13  ;;  %p1641_p1 = por %p1640_p0, %p1639_p12 }
  0x37   : > { %p1635_p9 = pneg %p1634_p7 }
  0x39   : > { %p1642_p2 = pnand %p1641_p1, %p1635_p9 }
  0x3b   : > { %1645 = shalt.err (!%p1642_p2)
}
  0x3c   : > { %1536 = dma.hbm_to_vmem [thread:$0]  (!%p1838_p11), %s2053_s3, 6144, %s1842_s6, [#allocation7], %s1750_s15, %s1750_s15, %s1751_s16  }
  0x3d   : > { %s1903_s29 = sadd.s32 1, %s1746_s21   ;;  %s29_s14 = sadd.s32 1, %s1742_s20 }
  0x3e   : > { %s26_s17 = ssub.s32 %s1746_s21, %s1903_s29  ;;  %p36_p13 = scmp.ne.s32.totalorder %s1742_s20, %s1738_s19 }
  0x3f   : > { %p27_p6 = scmp.eq.s32.totalorder %s26_s17, 0  ;;  %p37_p10 = scmp.eq.s32.totalorder %s1746_s21, 0 }
  0x40   : > { %p2063_p3 = scmp.eq.s32.totalorder %s1808_s22, 1  ;;  %p1547_p7 = scmp.lt.s32.totalorder %s1746_s21, 2 }
  0x41   : > { %s1919_s27 = scalar_select %p27_p6, %s1742_s20, %s29_s14  }
  0x42   : > { %p1913_p5 = por %p2063_p3, %p36_p13  ;;  %p38_p9 = por %p37_p10, %p36_p13 }
  0x43   : > { %s208_s30 = sand.u32 1, %s1742_s20   ;;  %s998_s6 = sshll.u32 %s1746_s21, 8 }
  0x44   : > { %s2064_s23 = scalar_select %p1913_p5, 1, 0 }
  0x45   : > { %s983_s7 = sshll.u32 %s208_s30, 4  ;;  %s1926_s10 = scalar_lea.hbm %s2050_s0, %s998_s6 }
  0x46   : > { %s212_s11 = scalar_lea.vmem [#allocation3], %s983_s7  ;;  %p1930_p11 = pnand %p1547_p7, %p38_p9 }
  0x47   : > { %s219_s28 = sshll.u32 %s212_s11, 4  ;;  %s1934_s13 = scalar_lea.sflag [#allocation4], %s208_s30  ;;  %s1928_s28 = int_to_ptr.vmem [resolvable:$true] %s219_s28 }
  0x48   : > { %s1646_s14 = scalar_lea.hbm %s1926_s10, 256  ;;  %p1648_p0 = pneg %p1930_p11 }
  0x49   : > { %p1647_p12 = scmp.ne.s32.totalorder %s1926_s10, %s1646_s14  ;;  %s1651_s6 = scalar_lea.hbm %s2050_s0, 512 }
  0x4a   : > { %p1652_p13 = scmp.lt.u32.totalorder %s1926_s10, %s2050_s0  ;;  %p1653_p6 = scmp.lt.u32.totalorder %s1651_s6, %s1646_s14 }
  0x4b   : > { %p1649_p1 = pnand %p1648_p0, %p1647_p12  ;;  %p1655_p3 = scmp.lt.u32.totalorder %s1646_s14, %s1926_s10 }
  0x4c   : > { %p1654_p10 = por %p1653_p6, %p1652_p13 }
  0x4d   : > { %p1650_p2 = pneg %p1649_p1 }
  0x4e   : > { %p1656_p7 = por %p1655_p3, %p1654_p10 }
  0x50   : > { %p1657_p9 = pnand %p1656_p7, %p1650_p2 }
  0x52   : > { %1660 = shalt.err (!%p1657_p9)
}
  0x53   : > { %s1661_s30 = scalar_lea.vmem %s1928_s28, 256  ;;  %s1752_s11 = smov [#allocation3]  }
  0x54   : > { %p1662_p12 = scmp.ne.s32.totalorder %s1928_s28, %s1661_s30  ;;  %s1666_s17 = sshll.u32 %s1752_s11, 4  ;;  %s1667_s17 = int_to_ptr.vmem [resolvable:$false] %s1666_s17 }
  0x55   : > { %s1668_s7 = scalar_lea.vmem %s1667_s17, 512  ;;  %p1669_p4 = scmp.lt.s32.totalorder %s1928_s28, %s1667_s17 }
  0x56   : > { %p1664_p1 = pnand %p1662_p12, %p1648_p0  ;;  %p1670_p13 = scmp.lt.s32.totalorder %s1668_s7, %s1661_s30 }
  0x58   : > { %p1665_p5 = pneg %p1664_p1  ;;  %p1671_p6 = por %p1670_p13, %p1669_p4 }
  0x5a   : > { %p1672_p10 = pnand %p1671_p6, %p1665_p5 }
  0x5c   : > { %1675 = shalt.err (!%p1672_p10)
}
  0x5d   : > { %1540 = dma.hbm_to_vmem [thread:$0]  (!%p1930_p11), %s1926_s10, 256, %s1928_s28, %s1934_s13, %s1750_s15, %s1750_s15, %s1751_s16  }
  0x5e   : > { %231 = sbr.rel (%p1827_p8) target bundleno = 720 (0x2d0), region = 40  ;;  %s1968_s14 = sand.u32 (!%p1827_p8), 1, %s1738_s19  }
  0x5f   : > { %s987_s6 = sshll.u32 (!%p1827_p8), %s1968_s14, 4  ;;  %s234_s8 = scalar_lea.sflag (!%p1827_p8), [#allocation4], %s1968_s14 }
  0x60   : > { %s237_s12 = scalar_lea.vmem (!%p1827_p8), [#allocation3], %s987_s6  ;;  %p2066_p4 = scmp.ne.s32.totalorder (!%p1827_p8), %s2059_s24, 0 }
  0x65   : > { %1721 = dma.done.wait (%p2066_p4), %s234_s8, 256  }
  0x66   : > { %1723 = vsyncadd (%p2066_p4), %s234_s8, 4294967040  ;;  %p2067_p5 = scmp.eq.s32.totalorder %s1808_s22, 0 }
  0x68   : > { %1725 = dma.done.wait (%p2067_p5), [#allocation7], 12288   ;;  %p2068_p8 = pmov %p2067_p5 }
  0x69   : > { %v1753_v0 = vmov 0.0   ;;  %v299_v1 = vld [vmem:[#allocation6 + $0x80] sm:$0xff]  ;;  %v300_v2 = vld [vmem:[#allocation6 + $0x88] sm:$0xff]  ;;  %v301_v3 = vld [vmem:[#allocation6 + $0x90] sm:$0xff]  ;;  %s271_s10 = scalar_lea.vmem [#allocation9], %s987_s6  ;;  %s999_s13 = sshll.u32 %s1808_s22, 8 }
  0x6a   : > { %1727 = vsyncadd (%p2068_p8), [#allocation7], 4294955008  ;;  %274 = vst [vmem:[#allocation2] sm:$0x1] %v1753_v0  ;;  %v1318_v4 = vpack.c.bf16 %v300_v2, %v299_v1  ;;  %v302_v5 = vld [vmem:[#allocation6 + $0x98] sm:$0xff]  ;;  %v303_v7 = vld [vmem:[#allocation6 + $0xa0] sm:$0xff]  ;;  %s2006_s11 = scalar_lea.hbm %s2055_s5, %s999_s13 }
  0x6b   : > { %275 = vst [vmem:[#allocation2 + $0x11] sm:$0x1] %v1753_v0  ;;  %v1322_v6 = vpack.c.bf16 %v302_v5, %v301_v3  ;;  %v304_v8 = vld [vmem:[#allocation6 + $0xa8] sm:$0xff]  ;;  %v1982_v10 = vld [vmem:[%s237_s12] sm:$0xff]  ;;  %v306_v12 = vld [vmem:[#allocation6 + $0xb8] sm:$0xff]  ;;  %s886_s28 = sshll.u32 %s271_s10, 4  ;;  %s2000_s28 = int_to_ptr.vmem [resolvable:$true] %s886_s28 }
  0x6c   : > { %1319 = vmatprep.subr.bf16.mxu0 %v1318_v4  ;;  %v1326_v9 = vpack.c.bf16 %v304_v8, %v303_v7  ;;  %v305_v11 = vld [vmem:[#allocation6 + $0xb0] sm:$0xff]  ;;  %276 = vst [vmem:[#allocation2 + $0x1] sm:$0xff] %v1982_v10  ;;  %1140 = vmatprep.mubr.f32.mxu0 %v1982_v10  ;;  %v1986_v13 = vld [vmem:[%s237_s12 + $0x8] sm:$0xff]  ;;  %v307_v15 = vld [vmem:[#allocation6 + $0xc0] sm:$0xff]  ;;  %s873_s17 = scalar_lea.sflag [#allocation5], %s1968_s14  ;;  %s1676_s22 = scalar_lea.vmem %s2000_s28, 256 }
  0x6d   : > { %1321 = vmatpush3.bf16.msra.mxu0 %v1318_v4  ;;  %277 = vst [vmem:[#allocation2 + $0x9] sm:$0xff] %v1986_v13  ;;  %v1330_v14 = vpack.c.bf16 %v306_v12, %v305_v11  ;;  %v308_v16 = vld [vmem:[#allocation6 + $0xc8] sm:$0xff]  ;;  %v309_v18 = vld [vmem:[#allocation6 + $0xd0] sm:$0xff]  ;;  %v310_v19 = vld [vmem:[#allocation6 + $0xd8] sm:$0xff]  ;;  %p1677_p11 = scmp.ne.s32.totalorder %s2000_s28, %s1676_s22  ;;  %p2069_p0 = scmp.ne.s32.totalorder %s2064_s23, 0 }
  0x6e   : > { %1323 = vmatprep.subr.bf16.mxu0 %v1322_v6  ;;  %v1334_v17 = vpack.c.bf16 %v308_v16, %v307_v15  ;;  %v1338_v20 = vpack.c.bf16 %v310_v19, %v309_v18  ;;  %v311_v21 = vld [vmem:[#allocation6 + $0xe0] sm:$0xff]  ;;  %v312_v22 = vld [vmem:[#allocation6 + $0xe8] sm:$0xff]  ;;  %v597_v25 = vld [vmem:[#allocation8 + $0x90] sm:$0xff]  ;;  %s1754_s7 = smov [#allocation9]  }
  0x6f   : > { %v595_v23 = vld [vmem:[#allocation8 + $0x80] sm:$0xff]  ;;  %v596_v24 = vld [vmem:[#allocation8 + $0x88] sm:$0xff]  ;;  %v598_v27 = vld [vmem:[#allocation8 + $0x98] sm:$0xff]  ;;  %v1342_v31 = vpack.c.bf16 %v312_v22, %v311_v21  ;;  %p1678_p2 = pnand %p1677_p11, %p2069_p0  ;;  %s1680_s6 = sshll.u32 %s1754_s7, 4  ;;  %s1681_s6 = int_to_ptr.vmem [resolvable:$false] %s1680_s6 }
  0x70   : > { %v1414_v26 = vpack.c.bf16 %v596_v24, %v595_v23  ;;  %v1418_v28 = vpack.c.bf16 %v598_v27, %v597_v25  ;;  %v599_v29 = vld [vmem:[#allocation8 + $0xa0] sm:$0xff]  ;;  %v600_v30 = vld [vmem:[#allocation8 + $0xa8] sm:$0xff]  ;;  %v313_v32 = vld [vmem:[#allocation6 + $0xf0] sm:$0xff]  ;;  %s1682_s8 = scalar_lea.vmem %s1681_s6, 512  ;;  %p1683_p7 = scmp.lt.s32.totalorder %s2000_s28, %s1681_s6 }
  0x71   : > { %1325 = vmatpush3.bf16.msra.mxu0 %v1322_v6  ;;  %v314_v33 = vld [vmem:[#allocation6 + $0xf8] sm:$0xff]  ;;  %v1422_v34 = vpack.c.bf16 %v600_v30, %v599_v29  ;;  %v601_v35 = vld [vmem:[#allocation8 + $0xb0] sm:$0xff]  ;;  %v280_v38 = vld [vmem:[#allocation6] sm:$0xff]  ;;  %p1679_p3 = pneg %p1678_p2  ;;  %p1684_p9 = scmp.lt.s32.totalorder %s1682_s8, %s1676_s22 }
  0x72   : > { %1327 = vmatprep.subr.bf16.mxu0 %v1326_v9  ;;  %1415 = vmatprep.subr.bf16.mxu1 %v1414_v26  ;;  %v602_v36 = vld [vmem:[#allocation8 + $0xb8] sm:$0xff]  ;;  %v1346_v37 = vpack.c.bf16 %v314_v33, %v313_v32  ;;  %v281_v39 = vld [vmem:[#allocation6 + $0x8] sm:$0xff]  ;;  %v603_v41 = vld [vmem:[#allocation8 + $0xc0] sm:$0xff] }
  0x73   : > { %1417 = vmatpush3.bf16.msra.mxu1 %v1414_v26  ;;  %v1426_v40 = vpack.c.bf16 %v602_v36, %v601_v35  ;;  %v604_v42 = vld [vmem:[#allocation8 + $0xc8] sm:$0xff]  ;;  %v1350_v43 = vpack.c.bf16 %v281_v39, %v280_v38  ;;  %v282_v44 = vld [vmem:[#allocation6 + $0x10] sm:$0xff]  ;;  %v283_v45 = vld [vmem:[#allocation6 + $0x18] sm:$0xff]  ;;  %p1685_p12 = por %p1684_p9, %p1683_p7 }
  0x74   : > { %1419 = vmatprep.subr.bf16.mxu1 %v1418_v28  ;;  %v1430_v46 = vpack.c.bf16 %v604_v42, %v603_v41  ;;  %v1354_v47 = vpack.c.bf16 %v283_v45, %v282_v44  ;;  %v278_v48 = vld [vmem:[#allocation2] sm:$0xff]  ;;  %v284_v49 = vld [vmem:[#allocation6 + $0x20] sm:$0xff]  ;;  %v286_v52 = vld [vmem:[#allocation6 + $0x30] sm:$0xff] }
  0x75   : > { %1329 = vmatpush3.bf16.msra.mxu0 %v1326_v9  ;;  %v285_v50 = vld [vmem:[#allocation6 + $0x28] sm:$0xff]  ;;  %v287_v53 = vld [vmem:[#allocation6 + $0x38] sm:$0xff]  ;;  %v288_v55 = vld [vmem:[#allocation6 + $0x40] sm:$0xff]  ;;  %p1686_p1 = pnand %p1685_p12, %p1679_p3 }
  0x76   : > { %1331 = vmatprep.subr.bf16.mxu0 %v1330_v14  ;;  %v1358_v51 = vpack.c.bf16 %v285_v50, %v284_v49  ;;  %v1362_v54 = vpack.c.bf16 %v287_v53, %v286_v52  ;;  %v289_v56 = vld [vmem:[#allocation6 + $0x48] sm:$0xff]  ;;  %v290_v58 = vld [vmem:[#allocation6 + $0x50] sm:$0xff]  ;;  %v291_v59 = vld [vmem:[#allocation6 + $0x58] sm:$0xff] }
  0x77   : > { %1421 = vmatpush3.bf16.msra.mxu1 %v1418_v28  ;;  %v1366_v57 = vpack.c.bf16 %v289_v56, %v288_v55  ;;  %v1370_v60 = vpack.c.bf16 %v291_v59, %v290_v58  ;;  %v292_v61 = vld [vmem:[#allocation6 + $0x60] sm:$0xff]  ;;  %v293_v62 = vld [vmem:[#allocation6 + $0x68] sm:$0xff]  ;;  %v294_v0 = vld [vmem:[#allocation6 + $0x70] sm:$0xff] }
  0x78   : > { %1423 = vmatprep.subr.bf16.mxu1 %v1422_v34  ;;  %v1374_v63 = vpack.c.bf16 %v293_v62, %v292_v61  ;;  %v295_v1 = vld [vmem:[#allocation6 + $0x78] sm:$0xff]  ;;  %v468_v3 = vld [vmem:[#allocation6 + $0x100] sm:$0xff]  ;;  %v469_v4 = vld [vmem:[#allocation6 + $0x108] sm:$0xff] }
  0x79   : > { %1333 = vmatpush3.bf16.msra.mxu0 %v1330_v14  ;;  %v1378_v2 = vpack.c.bf16 %v295_v1, %v294_v0  ;;  %v1382_v5 = vpack.c.bf16 %v469_v4, %v468_v3  ;;  %v470_v6 = vld [vmem:[#allocation6 + $0x110] sm:$0xff]  ;;  %v471_v7 = vld [vmem:[#allocation6 + $0x118] sm:$0xff]  ;;  %v472_v12 = vld [vmem:[#allocation6 + $0x120] sm:$0xff] }
  0x7a   : > { %1335 = vmatprep.subr.bf16.mxu0 %v1334_v17  ;;  %v279_v8 = vld [vmem:[#allocation2 + $0x8] sm:$0xff]  ;;  %v1386_v9 = vpack.c.bf16 %v471_v7, %v470_v6  ;;  %v473_v14 = vld [vmem:[#allocation6 + $0x128] sm:$0xff]  ;;  %v476_v19 = vld [vmem:[#allocation6 + $0x140] sm:$0xff] }
  0x7b   : > { %1425 = vmatpush3.bf16.msra.mxu1 %v1422_v34  ;;  %v465_v11 = vld [vmem:[#allocation2 + $0x2] sm:$0xff]  ;;  %v1390_v15 = vpack.c.bf16 %v473_v14, %v472_v12  ;;  %v479_v23 = vld [vmem:[#allocation6 + $0x158] sm:$0xff]  ;;  %v480_v25 = vld [vmem:[#allocation6 + $0x160] sm:$0xff] }
  0x7c   : > { %1427 = vmatprep.subr.bf16.mxu1 %v1426_v40  ;;  %v474_v16 = vld [vmem:[#allocation6 + $0x130] sm:$0xff]  ;;  %v481_v26 = vld [vmem:[#allocation6 + $0x168] sm:$0xff]  ;;  %v483_v29 = vld [vmem:[#allocation6 + $0x178] sm:$0xff] }
  0x7d   : > { %1337 = vmatpush3.bf16.msra.mxu0 %v1334_v17  ;;  %v475_v17 = vld [vmem:[#allocation6 + $0x138] sm:$0xff]  ;;  %v478_v22 = vld [vmem:[#allocation6 + $0x150] sm:$0xff]  ;;  %v1406_v27 = vpack.c.bf16 %v481_v26, %v480_v25  ;;  %v607_v35 = vld [vmem:[#allocation8 + $0xe0] sm:$0xff] }
  0x7e   : > { %1339 = vmatprep.subr.bf16.mxu0 %v1338_v20  ;;  %v1394_v18 = vpack.c.bf16 %v475_v17, %v474_v16  ;;  %v1402_v24 = vpack.c.bf16 %v479_v23, %v478_v22  ;;  %v482_v28 = vld [vmem:[#allocation6 + $0x170] sm:$0xff]  ;;  %v606_v33 = vld [vmem:[#allocation8 + $0xd8] sm:$0xff]  ;;  %v608_v36 = vld [vmem:[#allocation8 + $0xe8] sm:$0xff] }
  0x7f   : > { %1429 = vmatpush3.bf16.msra.mxu1 %v1426_v40  ;;  %v1410_v30 = vpack.c.bf16 %v483_v29, %v482_v28  ;;  %v605_v32 = vld [vmem:[#allocation8 + $0xd0] sm:$0xff]  ;;  %v610_v39 = vld [vmem:[#allocation8 + $0xf8] sm:$0xff]  ;;  %v576_v41 = vld [vmem:[#allocation8] sm:$0xff] }
  0x80   : > { %1431 = vmatprep.subr.bf16.mxu1 %v1430_v46  ;;  %v1434_v34 = vpack.c.bf16 %v606_v33, %v605_v32  ;;  %v609_v38 = vld [vmem:[#allocation8 + $0xf0] sm:$0xff]  ;;  %v577_v42 = vld [vmem:[#allocation8 + $0x8] sm:$0xff]  ;;  %v579_v50 = vld [vmem:[#allocation8 + $0x18] sm:$0xff] }
  0x81   : > { %1341 = vmatpush3.bf16.msra.mxu0 %v1338_v20  ;;  %v477_v20 = vld [vmem:[#allocation6 + $0x148] sm:$0xff]  ;;  %v1442_v40 = vpack.c.bf16 %v610_v39, %v609_v38  ;;  %v578_v49 = vld [vmem:[#allocation8 + $0x10] sm:$0xff]  ;;  %v583_v58 = vld [vmem:[#allocation8 + $0x38] sm:$0xff] }
  0x82   : > { %1343 = vmatprep.subr.bf16.mxu0 %v1342_v31  ;;  %v1398_v21 = vpack.c.bf16 %v477_v20, %v476_v19  ;;  %v991_v44 = vld [vmem:[%s2052_s2] ss:$0 sm:$0xff]  ;;  %v1450_v53 = vpack.c.bf16 %v579_v50, %v578_v49  ;;  %v584_v61 = vld [vmem:[#allocation8 + $0x40] sm:$0xff]  ;;  %v586_v0 = vld [vmem:[#allocation8 + $0x50] sm:$0xff] }
  0x83   : > { %1433 = vmatpush3.bf16.msra.mxu1 %v1430_v46  ;;  %v581_v55 = vld [vmem:[#allocation8 + $0x28] sm:$0xff]  ;;  %v587_v1 = vld [vmem:[#allocation8 + $0x58] sm:$0xff]  ;;  %v588_v3 = vld [vmem:[#allocation8 + $0x60] sm:$0xff] }
  0x84   : > { %1435 = vmatprep.subr.bf16.mxu1 %v1434_v34  ;;  %v585_v62 = vld [vmem:[#allocation8 + $0x48] sm:$0xff]  ;;  %v590_v6 = vld [vmem:[#allocation8 + $0x70] sm:$0xff]  ;;  %v591_v7 = vld [vmem:[#allocation8 + $0x78] sm:$0xff] }
  0x85   : > { %1345 = vmatpush3.bf16.msra.mxu0 %v1342_v31  ;;  %v466_v31 = vld [vmem:[#allocation2 + $0xa] sm:$0xff]  ;;  %v589_v4 = vld [vmem:[#allocation8 + $0x68] sm:$0xff]  ;;  %v772_v25 = vld [vmem:[#allocation8 + $0x140] sm:$0xff] }
  0x86   : > { %1347 = vmatprep.subr.bf16.mxu0 %v1346_v37  ;;  %v766_v14 = vld [vmem:[#allocation8 + $0x110] sm:$0xff]  ;;  %v769_v19 = vld [vmem:[#allocation8 + $0x128] sm:$0xff]  ;;  %v771_v23 = vld [vmem:[#allocation8 + $0x138] sm:$0xff] }
  0x87   : > { %1437 = vmatpush3.bf16.msra.mxu1 %v1434_v34  ;;  %v770_v22 = vld [vmem:[#allocation8 + $0x130] sm:$0xff]  ;;  %v773_v26 = vld [vmem:[#allocation8 + $0x148] sm:$0xff]  ;;  %v775_v29 = vld [vmem:[#allocation8 + $0x158] sm:$0xff] }
  0x88   : > { %v774_v28 = vld [vmem:[#allocation8 + $0x150] sm:$0xff]  ;;  %v777_v32 = vld [vmem:[#allocation8 + $0x168] sm:$0xff] }
  0x89   : > { %1349 = vmatpush3.bf16.msra.mxu0 %v1346_v37  ;;  %v1438_v37 = vpack.c.bf16 %v608_v36, %v607_v35  ;;  %v778_v34 = vld [vmem:[#allocation8 + $0x170] sm:$0xff]  ;;  %v779_v35 = vld [vmem:[#allocation8 + $0x178] sm:$0xff]  ;;  %v992_v38 = vld [vmem:[%s2054_s4] ss:$0 sm:$0xff] }
  0x8a   : > { %1351 = vmatprep.subr.bf16.mxu0 %v1350_v43  ;;  %v1506_v36 = vpack.c.bf16 %v779_v35, %v778_v34 }
  0x8b   : > { %1439 = vmatprep.subr.bf16.mxu1 %v1438_v37 }
  0x8c   : > { %1141 = vmatmul.mubr.f32.vlgmr.msra.gmra.mrb[0].mxu0 %v1986_v13  ;;  %1441 = vmatpush3.bf16.msra.mxu1 %v1438_v37 }
  0x8d   : > { %1353 = vmatpush3.bf16.msra.mxu0 %v1350_v43  ;;  %1175 = vmatprep.mubr.f32.mxu0 %v278_v48  ;;  %v1446_v43 = vpack.c.bf16 %v577_v42, %v576_v41 }
  0x8e   : > { %1355 = vmatprep.subr.bf16.mxu0 %v1354_v47  ;;  %1443 = vmatprep.subr.bf16.mxu1 %v1442_v40 }
  0x90   : > { %1445 = vmatpush3.bf16.msra.mxu1 %v1442_v40 }
  0x91   : > { %1357 = vmatpush3.bf16.msra.mxu0 %v1354_v47  ;;  %1447 = vmatprep.subr.bf16.mxu1 %v1446_v43 }
  0x92   : > { %1359 = vmatprep.subr.bf16.mxu0 %v1358_v51 }
  0x95   : > { %1361 = vmatpush3.bf16.msra.mxu0 %v1358_v51 }
  0x96   : > { %1363 = vmatprep.subr.bf16.mxu0 %v1362_v54 }
  0x99   : > { %1365 = vmatpush3.bf16.msra.mxu0 %v1362_v54  ;;  %v580_v54 = vld [vmem:[#allocation8 + $0x20] sm:$0xff] }
  0x9a   : > { %1367 = vmatprep.subr.bf16.mxu0 %v1366_v57  ;;  %v1454_v56 = vpack.c.bf16 %v581_v55, %v580_v54 }
  0x9d   : > { %1369 = vmatpush3.bf16.msra.mxu0 %v1366_v57  ;;  %v582_v57 = vld [vmem:[#allocation8 + $0x30] sm:$0xff] }
  0x9e   : > { %1371 = vmatprep.subr.bf16.mxu0 %v1370_v60 }
  0xa1   : > { %1373 = vmatpush3.bf16.msra.mxu0 %v1370_v60  ;;  %v1458_v60 = vpack.c.bf16 %v583_v58, %v582_v57 }
  0xa2   : > { %1375 = vmatprep.subr.bf16.mxu0 %v1374_v63 }
  0xa5   : > { %1377 = vmatpush3.bf16.msra.mxu0 %v1374_v63  ;;  %v1462_v63 = vpack.c.bf16 %v585_v62, %v584_v61 }
  0xa6   : > { %1379 = vmatprep.subr.bf16.mxu0 %v1378_v2 }
  0xa9   : > { %1381 = vmatpush3.bf16.msra.mxu0 %v1378_v2  ;;  %v1466_v2 = vpack.c.bf16 %v587_v1, %v586_v0 }
  0xaa   : > { %1383 = vmatprep.subr.bf16.mxu0 %v1382_v5 }
  0xac   : > { %1176 = vmatmul.mubr.f32.vlgmr.msra.gmra.mrb[0].mxu0 %v279_v8  ;;  %v1474_v8 = vpack.c.bf16 %v591_v7, %v590_v6 }
  0xad   : > { %1385 = vmatpush3.bf16.msra.mxu0 %v1382_v5  ;;  %1210 = vmatprep.mubr.f32.mxu0 %v465_v11  ;;  %v1470_v5 = vpack.c.bf16 %v589_v4, %v588_v3  ;;  %v765_v11 = vld [vmem:[#allocation8 + $0x108] sm:$0xff] }
  0xae   : > { %1387 = vmatprep.subr.bf16.mxu0 %v1386_v9 }
  0xb1   : > { %1389 = vmatpush3.bf16.msra.mxu0 %v1386_v9  ;;  %v764_v9 = vld [vmem:[#allocation8 + $0x100] sm:$0xff] }
  0xb2   : > { %1391 = vmatprep.subr.bf16.mxu0 %v1390_v15  ;;  %v1478_v12 = vpack.c.bf16 %v765_v11, %v764_v9 }
  0xb5   : > { %1393 = vmatpush3.bf16.msra.mxu0 %v1390_v15  ;;  %v767_v15 = vld [vmem:[#allocation8 + $0x118] sm:$0xff] }
  0xb6   : > { %1395 = vmatprep.subr.bf16.mxu0 %v1394_v18  ;;  %v1482_v16 = vpack.c.bf16 %v767_v15, %v766_v14 }
  0xb9   : > { %1397 = vmatpush3.bf16.msra.mxu0 %v1394_v18  ;;  %v768_v18 = vld [vmem:[#allocation8 + $0x120] sm:$0xff] }
  0xba   : > { %1399 = vmatprep.subr.bf16.mxu0 %v1398_v21 }
  0xbd   : > { %1401 = vmatpush3.bf16.msra.mxu0 %v1398_v21  ;;  %v1486_v21 = vpack.c.bf16 %v769_v19, %v768_v18 }
  0xbe   : > { %1403 = vmatprep.subr.bf16.mxu0 %v1402_v24 }
  0xc1   : > { %1405 = vmatpush3.bf16.msra.mxu0 %v1402_v24  ;;  %v1490_v24 = vpack.c.bf16 %v771_v23, %v770_v22 }
  0xc2   : > { %1407 = vmatprep.subr.bf16.mxu0 %v1406_v27 }
  0xc5   : > { %1409 = vmatpush3.bf16.msra.mxu0 %v1406_v27  ;;  %v1494_v27 = vpack.c.bf16 %v773_v26, %v772_v25 }
  0xc6   : > { %1411 = vmatprep.subr.bf16.mxu0 %v1410_v30 }
  0xc9   : > { %1413 = vmatpush3.bf16.msra.mxu0 %v1410_v30  ;;  %v1498_v30 = vpack.c.bf16 %v775_v29, %v774_v28 }
  0xcc   : > { %1211 = vmatmul.mubr.f32.vlgmr.msra.gmra.mrb[0].mxu0 %v466_v31  ;;  %v776_v31 = vld [vmem:[#allocation8 + $0x160] sm:$0xff] }
  0xcd   : > { %v1502_v33 = vpack.c.bf16 %v777_v32, %v776_v31 }
 0x19f   : > { %v1212_v45 = vpop.f32.mrb[0].mxu0 }
 0x1a0   : > { %v569_v46 = vadd.f32 %v1212_v45, %v991_v44  ;;  %v550_v47 = vpop.f32.mrb[1].mxu0 }
 0x1a1   : > { %v568_v48 = vadd.f32 %v991_v44, %v550_v47 }
 0x1a2   : > { %v571_v51 = vmax.f32 %v569_v46, 0.0 }
 0x1a3   : > { %v570_v52 = vmax.f32 %v568_v48, 0.0 }
 0x1a4   : > { %573 = vst [vmem:[#allocation2 + $0x9] sm:$0xff] %v571_v51 }
 0x1a5   : > { %572 = vst [vmem:[#allocation2 + $0x1] sm:$0xff] %v570_v52  ;;  %1245 = vmatprep.mubr.f32.mxu1 %v570_v52 }
 0x1a6   : > { %1246 = vmatmul.mubr.f32.vlgmr.msra.gmra.mrb[0].mxu1 %v571_v51 }
 0x1a7   : > { %1449 = vmatpush3.bf16.msra.mxu1 %v1446_v43 }
 0x1a8   : > { %1451 = vmatprep.subr.bf16.mxu1 %v1450_v53 }
 0x1ab   : > { %1453 = vmatpush3.bf16.msra.mxu1 %v1450_v53  ;;  %v762_v37 = vld [vmem:[#allocation2 + $0xa] sm:$0xff] }
 0x1ac   : > { %v574_v59 = vld [vmem:[#allocation2] sm:$0xff]  ;;  %1455 = vmatprep.subr.bf16.mxu1 %v1454_v56  ;;  %v575_v17 = vld [vmem:[#allocation2 + $0x8] sm:$0xff] }
 0x1ad   : > { %1280 = vmatprep.mubr.f32.mxu1 %v574_v59  ;;  %v761_v20 = vld [vmem:[#allocation2 + $0x2] sm:$0xff] }
 0x1af   : > { %1457 = vmatpush3.bf16.msra.mxu1 %v1454_v56 }
 0x1b0   : > { %1459 = vmatprep.subr.bf16.mxu1 %v1458_v60 }
 0x1b3   : > { %1461 = vmatpush3.bf16.msra.mxu1 %v1458_v60 }
 0x1b4   : > { %1463 = vmatprep.subr.bf16.mxu1 %v1462_v63 }
 0x1b7   : > { %1465 = vmatpush3.bf16.msra.mxu1 %v1462_v63 }
 0x1b8   : > { %1467 = vmatprep.subr.bf16.mxu1 %v1466_v2 }
 0x1bb   : > { %1469 = vmatpush3.bf16.msra.mxu1 %v1466_v2 }
 0x1bc   : > { %1471 = vmatprep.subr.bf16.mxu1 %v1470_v5 }
 0x1bf   : > { %1473 = vmatpush3.bf16.msra.mxu1 %v1470_v5 }
 0x1c0   : > { %1475 = vmatprep.subr.bf16.mxu1 %v1474_v8 }
 0x1c3   : > { %1477 = vmatpush3.bf16.msra.mxu1 %v1474_v8 }
 0x1c4   : > { %1479 = vmatprep.subr.bf16.mxu1 %v1478_v12 }
 0x1c6   : > { %1281 = vmatmul.mubr.f32.vlgmr.msra.gmra.mrb[0].mxu1 %v575_v17 }
 0x1c7   : > { %1481 = vmatpush3.bf16.msra.mxu1 %v1478_v12  ;;  %1315 = vmatprep.mubr.f32.mxu1 %v761_v20 }
 0x1c8   : > { %1483 = vmatprep.subr.bf16.mxu1 %v1482_v16 }
 0x1cb   : > { %1485 = vmatpush3.bf16.msra.mxu1 %v1482_v16 }
 0x1cc   : > { %1487 = vmatprep.subr.bf16.mxu1 %v1486_v21 }
 0x1cf   : > { %1489 = vmatpush3.bf16.msra.mxu1 %v1486_v21 }
 0x1d0   : > { %1491 = vmatprep.subr.bf16.mxu1 %v1490_v24 }
 0x1d3   : > { %1493 = vmatpush3.bf16.msra.mxu1 %v1490_v24 }
 0x1d4   : > { %1495 = vmatprep.subr.bf16.mxu1 %v1494_v27 }
 0x1d7   : > { %1497 = vmatpush3.bf16.msra.mxu1 %v1494_v27 }
 0x1d8   : > { %1499 = vmatprep.subr.bf16.mxu1 %v1498_v30 }
 0x1db   : > { %1501 = vmatpush3.bf16.msra.mxu1 %v1498_v30 }
 0x1dc   : > { %1503 = vmatprep.subr.bf16.mxu1 %v1502_v33 }
 0x1df   : > { %1505 = vmatpush3.bf16.msra.mxu1 %v1502_v33 }
 0x1e0   : > { %1507 = vmatprep.subr.bf16.mxu1 %v1506_v36 }
 0x1e3   : > { %1509 = vmatpush3.bf16.msra.mxu1 %v1506_v36 }
 0x1e6   : > { %1316 = vmatmul.mubr.f32.vlgmr.msra.gmra.mrb[0].mxu1 %v762_v37 }
 0x2b9   : > { %v1317_v39 = vpop.f32.mrb[0].mxu1 }
 0x2ba   : > { %v865_v40 = vadd.f32 %v1317_v39, %v992_v38  ;;  %v846_v41 = vpop.f32.mrb[1].mxu1 }
 0x2bb   : > { %v864_v42 = vadd.f32 %v992_v38, %v846_v41 }
 0x2bc   : > { %v867_v43 = vadd.f32 %v865_v40, %v1986_v13 }
 0x2bd   : > { %v866_v44 = vadd.f32 %v864_v42, %v1982_v10 }
 0x2be   : > { %v869_v45 = vmax.f32 %v867_v43, 0.0 }
 0x2bf   : > { %v868_v46 = vmax.f32 %v866_v44, 0.0 }
 0x2c0   : > { %871 = vst [vmem:[%s271_s10 + $0x8] sm:$0xff] %v869_v45 }
 0x2c1   : > { %870 = vst [vmem:[%s271_s10] sm:$0xff] %v868_v46 }
 0x2c2   : > { %1689 = shalt.err (!%p1686_p1)
}
 0x2c3   : > { %s1690_s12 = scalar_lea.hbm %s2006_s11, 256  ;;  %s1694_s15 = scalar_lea.hbm %s2055_s5, 512 }
 0x2c4   : > { %p1691_p13 = scmp.ne.s32.totalorder %s2006_s11, %s1690_s12  ;;  %p1695_p4 = scmp.lt.u32.totalorder %s2006_s11, %s2055_s5 }
 0x2c5   : > { %p1696_p5 = scmp.lt.u32.totalorder %s1694_s15, %s1690_s12  ;;  %p1698_p11 = scmp.lt.u32.totalorder %s1690_s12, %s2006_s11 }
 0x2c6   : > { %p1692_p6 = pnand %p1691_p13, %p2069_p0 }
 0x2c7   : > { %p1697_p8 = por %p1696_p5, %p1695_p4 }
 0x2c8   : > { %p1693_p10 = pneg %p1692_p6 }
 0x2c9   : > { %p1699_p2 = por %p1698_p11, %p1697_p8 }
 0x2cb   : > { %p1700_p3 = pnand %p1699_p2, %p1693_p10 }
 0x2cd   : > { %1703 = shalt.err (!%p1700_p3)
}
 0x2ce   : > { %s1755_s13 = smov 128   ;;  %s1756_s9 = smov 8  }
 0x2cf   : > { %1528 = dma.vmem_to_hbm [thread:$0]  (%p2069_p0), %s2000_s28, 256, %s2006_s11, %s873_s17, %s1755_s13, %s1755_s13, %s1756_s9  }
 0x2d0 PF: > { %s901_s30 = sand.u32 1, %s1734_s18   ;;  %p2070_p7 = scmp.ne.s32.totalorder %s2060_s25, 0 }
 0x2d1   : > { %p2071_p9 = scmp.ge.s32.totalorder %s1746_s21, 2  ;;  %s902_s22 = scalar_lea.sflag [#allocation5], %s901_s30 }
 0x2d3   : > { %p1542_p12 = pnand %p2071_p9, %p2070_p7 }
 0x2d5   : > { %1729 = dma.done.wait (!%p1542_p12), %s902_s22, 256  }
 0x2d6   : > { %1731 = vsyncadd (!%p1542_p12), %s902_s22, 4294967040  ;;  %p19_p1 = scmp.ge.s32.totalorder %s1903_s29, 4   ;;  %s2072_s18 = smov %s1738_s19 }
 0x2d7   : > { %s2073_s19 = smov %s1742_s20  ;;  %s2074_s20 = smov %s1919_s27 }
 0x2d8   : > { %s2075_s21 = smov %s1903_s29  ;;  %21 = sbr.rel (!%p19_p1) target bundleno = 6 (0x6), region = 97 }
 0x2df   :  { %907 = vsyncpa [#allocation4], 1 }
 0x2e0   :  { %909 = vsyncpa [#allocation4 + $0x1], 1 }
 0x2e1   :  { %910 = vsyncpa [#allocation7], 1 }
 0x2e2   :  { %911 = vsyncpa [#allocation5], 1 }
 0x2e3   :  { %913 = vsyncpa [#allocation5 + $0x1], 1 }

</bundles_post_ra>
